<compile_context>
chip_gen: v7x
topology: tpu7x:2x2x1
jax: 0.10.0
libtpu: 0.0.40
codegen_flags: <defaults>
</compile_context>

<pallas_src>
import functools

import jax
import jax.numpy as jnp
import numpy as np
from jax.experimental import pallas as pl
from jax.experimental.pallas import tpu as pltpu

DOT = functools.partial(jnp.dot, preferred_element_type=jnp.float32)

EDGE_TILE = 1024   # edges per grid step in the edge-MLP stage
NODE_TILE = 256    # node-stage tile (rows "parallel", reduction "arbitrary")


def _vmem_limit_bytes():
    """Per-generation scoped-VMEM budget: v7x has 64 MiB physical, v5e/v6e 128 MiB."""
    try:
        kind = jax.devices()[0].device_kind.lower()
    except Exception:
        kind = ""
    if "v7" in kind:
        return 48 * 1024 * 1024
    return 96 * 1024 * 1024


def _edge_term(se, we):
    """(rows, C_e) @ (C_e, H).  For C_e == 1 use a VPU broadcast-mul, not a K=1 MXU pass."""
    if se.shape[1] == 1:
        return se * we
    return DOT(se, we)


def _make_gcn_conv_kernel(project):
    """One GCNConv layer, tiled over (out-row tiles, N-reduction tiles).

    out = relu(A_norm @ (Xin @ Wn) + s_e @ We)            (project=False)
    out = relu(...same...) @ Wcat                          (project=True, fused
          first edge-MLP projection [Wm1_i | Wm1_j])
    """
    def kernel(a_ref, x_ref, se_ref, wn_ref, we_ref, *rest):
        if project:
            wcat_ref, out_ref, acc_ref = rest
        else:
            out_ref, acc_ref = rest
        k = pl.program_id(1)

        @pl.when(k == 0)
        def _():
            acc_ref[...] = jnp.zeros_like(acc_ref)

        xw = DOT(x_ref[...], wn_ref[...])            # (tk, F) @ (F, H)
        acc_ref[...] += DOT(a_ref[...], xw)          # (tm, tk) @ (tk, H)

        @pl.when(k == pl.num_programs(1) - 1)
        def _():
            h = acc_ref[...] + _edge_term(se_ref[...], we_ref[...])
            h = jnp.maximum(h, 0.0)
            if project:
                out_ref[...] = DOT(h, wcat_ref[...])
            else:
                out_ref[...] = h

    return kernel


def _gcn_conv(a_norm, xin, s_e, wn, we, wcat=None, *, tm, tk, vmem_limit):
    n_pad = a_norm.shape[0]
    f_in = xin.shape[1]
    hidden = wn.shape[1]
    c_e = s_e.shape[1]
    out_cols = wcat.shape[1] if wcat is not None else hidden

    in_specs = [
        pl.BlockSpec((tm, tk), lambda i, k: (i, k)),       # A_norm tile
        pl.BlockSpec((tk, f_in), lambda i, k: (k, 0)),     # input rows for this k slab
        pl.BlockSpec((tm, c_e), lambda i, k: (i, 0)),      # segment-summed edge term
        pl.BlockSpec((f_in, hidden), lambda i, k: (0, 0)),
        pl.BlockSpec((c_e, hidden), lambda i, k: (0, 0)),
    ]
    args = [a_norm, xin, s_e, wn, we]
    if wcat is not None:
        in_specs.append(pl.BlockSpec((hidden, out_cols), lambda i, k: (0, 0)))
        args.append(wcat)

    return pl.pallas_call(
        _make_gcn_conv_kernel(wcat is not None),
        out_shape=jax.ShapeDtypeStruct((n_pad, out_cols), jnp.float32),
        grid=(n_pad // tm, n_pad // tk),
        in_specs=in_specs,
        out_specs=pl.BlockSpec((tm, out_cols), lambda i, k: (i, 0)),
        scratch_shapes=[pltpu.VMEM((tm, hidden), jnp.float32)],
        compiler_params=pltpu.CompilerParams(
            dimension_semantics=("parallel", "arbitrary"),
            vmem_limit_bytes=vmem_limit),
    )(*args)


def edge_mlp_kernel(row_ref, col_ref, ea_ref, g_ref,
                    wm1e_ref, bm1_ref, wm2_ref, bm2_ref, out_ref):
    """Per-edge-tile MLP.

    The node projection table g = relu(h2) @ [Wm1_i | Wm1_j] is VMEM-resident
    (constant-index BlockSpec), and the per-edge row/col rows are gathered
    in-kernel, so gi_rows/gj_rows never round-trip through HBM.
    """
    hidden = bm1_ref.shape[1]
    n_pad = g_ref.shape[0]
    te = row_ref.shape[0]

    ridx = row_ref[...]                                              # (TE, 1) int32
    cidx = col_ref[...]
    node_ids = jax.lax.broadcasted_iota(jnp.int32, (te, n_pad), 1)
    # One-hot MXU gather of the resident table: cheap while n_pad stays modest.
    # TODO(synk): for very large N replace with a scalar-prefetched DMA row gather.
    oh_i = (node_ids == ridx).astype(jnp.float32)
    oh_j = (node_ids == cidx).astype(jnp.float32)
    g = g_ref[...]
    gi = DOT(oh_i, g[:, :hidden])        # == h2[row] @ Wm1_i
    gj = DOT(oh_j, g[:, hidden:])        # == h2[col] @ Wm1_j

    m1 = gi + gj + _edge_term(ea_ref[...], wm1e_ref[...]) + bm1_ref[...]
    m1 = jnp.maximum(m1, 0.0)
    # Narrow (out_ch-lane) full-extent store: avoids the 64x write amplification
    # of a 128-lane-padded output at out_ch=2.
    out_ref[...] = DOT(m1, wm2_ref[...]) + bm2_ref[...]


def edgenet_forward(x, edge_index, edge_attr, params):
    N, f_in = x.shape
    E = edge_index.shape[1]
    c_e = edge_attr.shape[1]
    hidden = params["wn1"].shape[1]
    out_ch = params["wm2"].shape[1]
    vmem_limit = _vmem_limit_bytes()

    edge_index = edge_index.astype(jnp.int32)
    row, col = edge_index[0], edge_index[1]

    # --- glue: self loops + symmetric GCN normalization (the cached=True path) ---
    loop = jnp.arange(N, dtype=jnp.int32)
    row_sl = jnp.concatenate([row, loop])
    col_sl = jnp.concatenate([col, loop])
    e_tot = E + N
    deg = jnp.zeros((N,), jnp.float32).at[col_sl].add(jnp.ones((e_tot,), jnp.float32))
    deg_inv_sqrt = jnp.where(deg > 0, jax.lax.rsqrt(deg), 0.0)
    norm = deg_inv_sqrt[row_sl] * deg_inv_sqrt[col_sl]

    # Node-stage tiling.
    if N <= NODE_TILE:
        n_pad = max(8, ((N + 7) // 8) * 8)
        tm = tk = n_pad
    else:
        n_pad = ((N + NODE_TILE - 1) // NODE_TILE) * NODE_TILE
        tm = tk = NODE_TILE

    # Densified node->node operator and the reassociated edge term
    # s_e = S @ edge_attr_padded (self-loop rows contribute exactly zero).
    # TODO(synk): for large sparse graphs replace the dense (N,N) a_norm with a
    # sorted-edge segment-sum formulation (scalar-prefetched edge tiles).
    a_norm = jnp.zeros((n_pad, n_pad), jnp.float32).at[col_sl, row_sl].add(norm)
    s_e = jnp.zeros((n_pad, c_e), jnp.float32).at[col].add(norm[:E, None] * edge_attr)
    x_pad = jnp.zeros((n_pad, f_in), jnp.float32).at[:N].set(x.astype(jnp.float32))

    # Fuse the two per-node halves of the first edge-MLP layer into one weight.
    wm1 = params["wm1"]
    wcat = jnp.concatenate([wm1[:hidden], wm1[hidden:2 * hidden]], axis=1)  # (H, 2H)
    wm1_e = wm1[2 * hidden:]                                                # (C_e, H)

    # --- stage 1: two GCNConv layers (tiled grid, megacore-parallel over rows) ---
    h = _gcn_conv(a_norm, x_pad, s_e, params["wn1"], params["we1"],
                  tm=tm, tk=tk, vmem_limit=vmem_limit)                 # (n_pad, H)
    g = _gcn_conv(a_norm, h, s_e, params["wn2"], params["we2"], wcat,
                  tm=tm, tk=tk, vmem_limit=vmem_limit)                 # (n_pad, 2H)

    # --- stage 2: edge MLP tiled over E; g stays VMEM-resident, gathered in-kernel ---
    e_tile = min(EDGE_TILE, max(8, ((E + 7) // 8) * 8))
    e_pad = ((E + e_tile - 1) // e_tile) * e_tile
    pad_e = e_pad - E
    row_p = jnp.concatenate([row, jnp.zeros((pad_e,), jnp.int32)]).reshape(e_pad, 1)
    col_p = jnp.concatenate([col, jnp.zeros((pad_e,), jnp.int32)]).reshape(e_pad, 1)
    ea_p = jnp.concatenate(
        [edge_attr.astype(jnp.float32), jnp.zeros((pad_e, c_e), jnp.float32)], axis=0)

    n_tiles = e_pad // e_tile
    out = pl.pallas_call(
        edge_mlp_kernel,
        out_shape=jax.ShapeDtypeStruct((e_pad, out_ch), jnp.float32),
        grid=(n_tiles,),
        in_specs=[
            pl.BlockSpec((e_tile, 1), lambda e: (e, 0)),               # row indices
            pl.BlockSpec((e_tile, 1), lambda e: (e, 0)),               # col indices
            pl.BlockSpec((e_tile, c_e), lambda e: (e, 0)),             # edge_attr tile
            pl.BlockSpec((n_pad, 2 * hidden), lambda e: (0, 0)),       # resident g table
            pl.BlockSpec((c_e, hidden), lambda e: (0, 0)),
            pl.BlockSpec((1, hidden), lambda e: (0, 0)),
            pl.BlockSpec((hidden, out_ch), lambda e: (0, 0)),
            pl.BlockSpec((1, out_ch), lambda e: (0, 0)),
        ],
        out_specs=pl.BlockSpec((e_tile, out_ch), lambda e: (e, 0)),
        compiler_params=pltpu.CompilerParams(
            dimension_semantics=("parallel",),
            vmem_limit_bytes=vmem_limit),
    )(row_p, col_p, ea_p, g, wm1_e, params["bm1"], params["wm2"], params["bm2"])

    # Padded rows (E..e_pad) gathered node 0 and computed garbage; slice them off.
    return out[:E]


def ref_forward(x, edge_index, edge_attr, params):
    """Pure-JAX reference using scatter-add message passing (PyG semantics)."""
    N = x.shape[0]
    row, col = edge_index[0], edge_index[1]
    loop = jnp.arange(N, dtype=edge_index.dtype)
    row_sl = jnp.concatenate([row, loop])
    col_sl = jnp.concatenate([col, loop])
    e_tot = row_sl.shape[0]
    deg = jnp.zeros((N,), jnp.float32).at[col_sl].add(jnp.ones((e_tot,), jnp.float32))
    dis = jnp.where(deg > 0, jax.lax.rsqrt(deg), 0.0)
    norm = dis[row_sl] * dis[col_sl]
    eap = jnp.concatenate(
        [edge_attr, jnp.zeros((N, edge_attr.shape[1]), edge_attr.dtype)], axis=0)

    def conv(h, wn, we):
        ne = h @ wn
        ee = eap @ we
        msg = norm[:, None] * (ne[row_sl] + ee)
        return jnp.zeros((N, wn.shape[1]), jnp.float32).at[col_sl].add(msg)

    h = jax.nn.relu(conv(x, params["wn1"], params["we1"]))
    h = jax.nn.relu(conv(h, params["wn2"], params["we2"]))
    er = jnp.concatenate([h[row], h[col], edge_attr], axis=1)
    m1 = jax.nn.relu(er @ params["wm1"] + params["bm1"])
    return m1 @ params["wm2"] + params["bm2"]


if __name__ == "__main__":
    in_channels, hidden_channels, out_channels, edge_channels = 4, 16, 2, 1
    N, E = 4, 10  # matches edge_index = randint(0, 4, size=(2, 10))

    key = jax.random.PRNGKey(0)
    ks = jax.random.split(key, 12)
    edge_index = jax.random.randint(ks[0], (2, E), 0, N, dtype=jnp.int32)
    x = jax.random.normal(ks[1], (N, in_channels), jnp.float32)
    edge_attr = jax.random.normal(ks[2], (E, edge_channels), jnp.float32)

    def init(k, shape, scale=0.3):
        return scale * jax.random.normal(k, shape, jnp.float32)

    params = dict(
        wn1=init(ks[3], (in_channels, hidden_channels)),
        we1=init(ks[4], (edge_channels, hidden_channels)),
        wn2=init(ks[5], (hidden_channels, hidden_channels)),
        we2=init(ks[6], (edge_channels, hidden_channels)),
        wm1=init(ks[7], (2 * hidden_channels + edge_channels, hidden_channels)),
        bm1=init(ks[8], (1, hidden_channels)),
        wm2=init(ks[9], (hidden_channels, out_channels)),
        bm2=init(ks[10], (1, out_channels)),
    )

    out = jax.jit(edgenet_forward)(x, edge_index, edge_attr, params)
    out = jax.block_until_ready(out)
    ref = ref_forward(x, edge_index, edge_attr, params)
    # Default (non-HIGHEST) MXU precision; re-validate tolerance at production N.
    np.testing.assert_allclose(np.asarray(out), np.asarray(ref), rtol=2e-2, atol=2e-2)
    print("KERNEL_OK")
</pallas_src>

<mosaic_0001>
module attributes {stable_mosaic.version = 11 : i64} {
  func.func @kernel(%arg0: i32, %arg1: i32, %arg2: memref<8x8xf32, #tpu.memory_space<vmem>>, %arg3: memref<8x4xf32, #tpu.memory_space<vmem>>, %arg4: memref<8x1xf32, #tpu.memory_space<vmem>>, %arg5: memref<4x16xf32, #tpu.memory_space<vmem>>, %arg6: memref<1x16xf32, #tpu.memory_space<vmem>>, %arg7: memref<8x16xf32, #tpu.memory_space<vmem>>, %arg8: memref<8x16xf32, #tpu.memory_space<vmem>>) attributes {dimension_semantics = [#tpu.dimension_semantics<parallel>, #tpu.dimension_semantics<arbitrary>], iteration_bounds = array<i64: 1, 1>, scalar_prefetch = 0 : i64, scratch_operands = 1 : i64, tpu.core_type = #tpu.core_type<tc>, window_params = [{transform_indices = @transform_0, window_bounds = array<i64: 8, 8>}, {transform_indices = @transform_1, window_bounds = array<i64: 8, 4>}, {transform_indices = @transform_2, window_bounds = array<i64: 8, 1>}, {pipeline_mode = #tpu.pipeline_mode<synchronous>, transform_indices = @transform_3, window_bounds = array<i64: 4, 16>}, {pipeline_mode = #tpu.pipeline_mode<synchronous>, transform_indices = @transform_4, window_bounds = array<i64: 1, 16>}, {transform_indices = @transform_5, window_bounds = array<i64: 8, 16>}]} {
    %c0_i32 = arith.constant 0 : i32
    %0 = arith.cmpi eq, %arg1, %c0_i32 : i32
    %1 = arith.extui %0 : i1 to i32
    %c0_i32_0 = arith.constant 0 : i32
    %2 = arith.cmpi ne, %1, %c0_i32_0 : i32
    scf.if %2 {
      %cst_13 = arith.constant 0.000000e+00 : f32
      %14 = vector.broadcast %cst_13 : f32 to vector<8x16xf32>
      %c0_14 = arith.constant 0 : index
      %c0_15 = arith.constant 0 : index
      %15 = vector.load %arg8[%c0_14, %c0_15] : memref<8x16xf32, #tpu.memory_space<vmem>>, vector<8x16xf32>
      tpu.vector_store %arg8[%c0_14, %c0_15], %14 {strides = array<i32>} : memref<8x16xf32, #tpu.memory_space<vmem>>, vector<8x16xf32>,
    } else {
    }
    %c0 = arith.constant 0 : index
    %c0_1 = arith.constant 0 : index
    %3 = vector.load %arg3[%c0, %c0_1] : memref<8x4xf32, #tpu.memory_space<vmem>>, vector<8x4xf32>
    %c0_2 = arith.constant 0 : index
    %c0_3 = arith.constant 0 : index
    %4 = vector.load %arg5[%c0_2, %c0_3] : memref<4x16xf32, #tpu.memory_space<vmem>>, vector<4x16xf32>
    %cst = arith.constant dense<0.000000e+00> : vector<8x16xf32>
    %5 = tpu.matmul %3, %4, %cst {dimension_numbers = #tpu.dot_dimension_numbers<[1], [0], [0], [1], [0, 0, 1, 1], [], []>} : vector<8x4xf32>, vector<4x16xf32>, vector<8x16xf32> -> vector<8x16xf32>
    %c0_4 = arith.constant 0 : index
    %c0_5 = arith.constant 0 : index
    %6 = vector.load %arg8[%c0_4, %c0_5] : memref<8x16xf32, #tpu.memory_space<vmem>>, vector<8x16xf32>
    %c0_6 = arith.constant 0 : index
    %c0_7 = arith.constant 0 : index
    %7 = vector.load %arg2[%c0_6, %c0_7] : memref<8x8xf32, #tpu.memory_space<vmem>>, vector<8x8xf32>
    %cst_8 = arith.constant dense<0.000000e+00> : vector<8x16xf32>
    %8 = tpu.matmul %7, %5, %cst_8 {dimension_numbers = #tpu.dot_dimension_numbers<[1], [0], [0], [1], [0, 0, 1, 1], [], []>} : vector<8x8xf32>, vector<8x16xf32>, vector<8x16xf32> -> vector<8x16xf32>
    %9 = arith.addf %6, %8 : vector<8x16xf32>
    %c0_9 = arith.constant 0 : index
    %c0_10 = arith.constant 0 : index
    %10 = vector.load %arg8[%c0_9, %c0_10] : memref<8x16xf32, #tpu.memory_space<vmem>>, vector<8x16xf32>
    tpu.vector_store %arg8[%c0_9, %c0_10], %9 {strides = array<i32>} : memref<8x16xf32, #tpu.memory_space<vmem>>, vector<8x16xf32>,
    %c0_i32_11 = arith.constant 0 : i32
    %11 = arith.cmpi eq, %arg1, %c0_i32_11 : i32
    %12 = arith.extui %11 : i1 to i32
    %c0_i32_12 = arith.constant 0 : i32
    %13 = arith.cmpi ne, %12, %c0_i32_12 : i32
    scf.if %13 {
      %c0_13 = arith.constant 0 : index
      %c0_14 = arith.constant 0 : index
      %14 = vector.load %arg8[%c0_13, %c0_14] : memref<8x16xf32, #tpu.memory_space<vmem>>, vector<8x16xf32>
      %c0_15 = arith.constant 0 : index
      %c0_16 = arith.constant 0 : index
      %15 = vector.load %arg4[%c0_15, %c0_16] : memref<8x1xf32, #tpu.memory_space<vmem>>, vector<8x1xf32>
      %c0_17 = arith.constant 0 : index
      %c0_18 = arith.constant 0 : index
      %16 = vector.load %arg6[%c0_17, %c0_18] : memref<1x16xf32, #tpu.memory_space<vmem>>, vector<1x16xf32>
      %17 = vector.broadcast %15 : vector<8x1xf32> to vector<8x16xf32>
      %18 = vector.broadcast %16 : vector<1x16xf32> to vector<8x16xf32>
      %19 = arith.mulf %17, %18 : vector<8x16xf32>
      %20 = arith.addf %14, %19 : vector<8x16xf32>
      %cst_19 = arith.constant 0.000000e+00 : f32
      %21 = vector.broadcast %cst_19 : f32 to vector<8x16xf32>
      %22 = arith.maximumf %20, %21 : vector<8x16xf32>
      %c0_20 = arith.constant 0 : index
      %c0_21 = arith.constant 0 : index
      %23 = vector.load %arg7[%c0_20, %c0_21] : memref<8x16xf32, #tpu.memory_space<vmem>>, vector<8x16xf32>
      tpu.vector_store %arg7[%c0_20, %c0_21], %22 {strides = array<i32>} : memref<8x16xf32, #tpu.memory_space<vmem>>, vector<8x16xf32>,
    } else {
    }
    return
  }
  func.func @transform_0(%arg0: i32, %arg1: i32) -> (i32, i32) {
    %c0_i32 = arith.constant 0 : i32
    return %arg0, %arg1 : i32, i32
  }
  func.func @transform_1(%arg0: i32, %arg1: i32) -> (i32, i32) {
    %c0_i32 = arith.constant 0 : i32
    %c0_i32_0 = arith.constant 0 : i32
    return %arg1, %c0_i32 : i32, i32
  }
  func.func @transform_2(%arg0: i32, %arg1: i32) -> (i32, i32) {
    %c0_i32 = arith.constant 0 : i32
    %c0_i32_0 = arith.constant 0 : i32
    return %arg0, %c0_i32 : i32, i32
  }
  func.func @transform_3(%arg0: i32, %arg1: i32) -> (i32, i32) {
    %c0_i32 = arith.constant 0 : i32
    %c0_i32_0 = arith.constant 0 : i32
    %c0_i32_1 = arith.constant 0 : i32
    return %c0_i32, %c0_i32_0 : i32, i32
  }
  func.func @transform_4(%arg0: i32, %arg1: i32) -> (i32, i32) {
    %c0_i32 = arith.constant 0 : i32
    %c0_i32_0 = arith.constant 0 : i32
    %c0_i32_1 = arith.constant 0 : i32
    return %c0_i32, %c0_i32_0 : i32, i32
  }
  func.func @transform_5(%arg0: i32, %arg1: i32) -> (i32, i32) {
    %c0_i32 = arith.constant 0 : i32
    %c0_i32_0 = arith.constant 0 : i32
    return %arg0, %c0_i32 : i32, i32
  }
}

module attributes {stable_mosaic.version = 11 : i64} {
  func.func @kernel(%arg0: i32, %arg1: i32, %arg2: memref<8x8xf32, #tpu.memory_space<vmem>>, %arg3: memref<8x16xf32, #tpu.memory_space<vmem>>, %arg4: memref<8x1xf32, #tpu.memory_space<vmem>>, %arg5: memref<16x16xf32, #tpu.memory_space<vmem>>, %arg6: memref<1x16xf32, #tpu.memory_space<vmem>>, %arg7: memref<16x32xf32, #tpu.memory_space<vmem>>, %arg8: memref<8x32xf32, #tpu.memory_space<vmem>>, %arg9: memref<8x16xf32, #tpu.memory_space<vmem>>) attributes {dimension_semantics = [#tpu.dimension_semantics<parallel>, #tpu.dimension_semantics<arbitrary>], iteration_bounds = array<i64: 1, 1>, scalar_prefetch = 0 : i64, scratch_operands = 1 : i64, tpu.core_type = #tpu.core_type<tc>, window_params = [{transform_indices = @transform_0, window_bounds = array<i64: 8, 8>}, {transform_indices = @transform_1, window_bounds = array<i64: 8, 16>}, {transform_indices = @transform_2, window_bounds = array<i64: 8, 1>}, {pipeline_mode = #tpu.pipeline_mode<synchronous>, transform_indices = @transform_3, window_bounds = array<i64: 16, 16>}, {pipeline_mode = #tpu.pipeline_mode<synchronous>, transform_indices = @transform_4, window_bounds = array<i64: 1, 16>}, {pipeline_mode = #tpu.pipeline_mode<synchronous>, transform_indices = @transform_5, window_bounds = array<i64: 16, 32>}, {transform_indices = @transform_6, window_bounds = array<i64: 8, 32>}]} {
    %c0_i32 = arith.constant 0 : i32
    %0 = arith.cmpi eq, %arg1, %c0_i32 : i32
    %1 = arith.extui %0 : i1 to i32
    %c0_i32_0 = arith.constant 0 : i32
    %2 = arith.cmpi ne, %1, %c0_i32_0 : i32
    scf.if %2 {
      %cst_13 = arith.constant 0.000000e+00 : f32
      %14 = vector.broadcast %cst_13 : f32 to vector<8x16xf32>
      %c0_14 = arith.constant 0 : index
      %c0_15 = arith.constant 0 : index
      %15 = vector.load %arg9[%c0_14, %c0_15] : memref<8x16xf32, #tpu.memory_space<vmem>>, vector<8x16xf32>
      tpu.vector_store %arg9[%c0_14, %c0_15], %14 {strides = array<i32>} : memref<8x16xf32, #tpu.memory_space<vmem>>, vector<8x16xf32>,
    } else {
    }
    %c0 = arith.constant 0 : index
    %c0_1 = arith.constant 0 : index
    %3 = vector.load %arg3[%c0, %c0_1] : memref<8x16xf32, #tpu.memory_space<vmem>>, vector<8x16xf32>
    %c0_2 = arith.constant 0 : index
    %c0_3 = arith.constant 0 : index
    %4 = vector.load %arg5[%c0_2, %c0_3] : memref<16x16xf32, #tpu.memory_space<vmem>>, vector<16x16xf32>
    %cst = arith.constant dense<0.000000e+00> : vector<8x16xf32>
    %5 = tpu.matmul %3, %4, %cst {dimension_numbers = #tpu.dot_dimension_numbers<[1], [0], [0], [1], [0, 0, 1, 1], [], []>} : vector<8x16xf32>, vector<16x16xf32>, vector<8x16xf32> -> vector<8x16xf32>
    %c0_4 = arith.constant 0 : index
    %c0_5 = arith.constant 0 : index
    %6 = vector.load %arg9[%c0_4, %c0_5] : memref<8x16xf32, #tpu.memory_space<vmem>>, vector<8x16xf32>
    %c0_6 = arith.constant 0 : index
    %c0_7 = arith.constant 0 : index
    %7 = vector.load %arg2[%c0_6, %c0_7] : memref<8x8xf32, #tpu.memory_space<vmem>>, vector<8x8xf32>
    %cst_8 = arith.constant dense<0.000000e+00> : vector<8x16xf32>
    %8 = tpu.matmul %7, %5, %cst_8 {dimension_numbers = #tpu.dot_dimension_numbers<[1], [0], [0], [1], [0, 0, 1, 1], [], []>} : vector<8x8xf32>, vector<8x16xf32>, vector<8x16xf32> -> vector<8x16xf32>
    %9 = arith.addf %6, %8 : vector<8x16xf32>
    %c0_9 = arith.constant 0 : index
    %c0_10 = arith.constant 0 : index
    %10 = vector.load %arg9[%c0_9, %c0_10] : memref<8x16xf32, #tpu.memory_space<vmem>>, vector<8x16xf32>
    tpu.vector_store %arg9[%c0_9, %c0_10], %9 {strides = array<i32>} : memref<8x16xf32, #tpu.memory_space<vmem>>, vector<8x16xf32>,
    %c0_i32_11 = arith.constant 0 : i32
    %11 = arith.cmpi eq, %arg1, %c0_i32_11 : i32
    %12 = arith.extui %11 : i1 to i32
    %c0_i32_12 = arith.constant 0 : i32
    %13 = arith.cmpi ne, %12, %c0_i32_12 : i32
    scf.if %13 {
      %c0_13 = arith.constant 0 : index
      %c0_14 = arith.constant 0 : index
      %14 = vector.load %arg9[%c0_13, %c0_14] : memref<8x16xf32, #tpu.memory_space<vmem>>, vector<8x16xf32>
      %c0_15 = arith.constant 0 : index
      %c0_16 = arith.constant 0 : index
      %15 = vector.load %arg4[%c0_15, %c0_16] : memref<8x1xf32, #tpu.memory_space<vmem>>, vector<8x1xf32>
      %c0_17 = arith.constant 0 : index
      %c0_18 = arith.constant 0 : index
      %16 = vector.load %arg6[%c0_17, %c0_18] : memref<1x16xf32, #tpu.memory_space<vmem>>, vector<1x16xf32>
      %17 = vector.broadcast %15 : vector<8x1xf32> to vector<8x16xf32>
      %18 = vector.broadcast %16 : vector<1x16xf32> to vector<8x16xf32>
      %19 = arith.mulf %17, %18 : vector<8x16xf32>
      %20 = arith.addf %14, %19 : vector<8x16xf32>
      %cst_19 = arith.constant 0.000000e+00 : f32
      %21 = vector.broadcast %cst_19 : f32 to vector<8x16xf32>
      %22 = arith.maximumf %20, %21 : vector<8x16xf32>
      %c0_20 = arith.constant 0 : index
      %c0_21 = arith.constant 0 : index
      %23 = vector.load %arg7[%c0_20, %c0_21] : memref<16x32xf32, #tpu.memory_space<vmem>>, vector<16x32xf32>
      %cst_22 = arith.constant dense<0.000000e+00> : vector<8x32xf32>
      %24 = tpu.matmul %22, %23, %cst_22 {dimension_numbers = #tpu.dot_dimension_numbers<[1], [0], [0], [1], [0, 0, 1, 1], [], []>} : vector<8x16xf32>, vector<16x32xf32>, vector<8x32xf32> -> vector<8x32xf32>
      %c0_23 = arith.constant 0 : index
      %c0_24 = arith.constant 0 : index
      %25 = vector.load %arg8[%c0_23, %c0_24] : memref<8x32xf32, #tpu.memory_space<vmem>>, vector<8x32xf32>
      tpu.vector_store %arg8[%c0_23, %c0_24], %24 {strides = array<i32>} : memref<8x32xf32, #tpu.memory_space<vmem>>, vector<8x32xf32>,
    } else {
    }
    return
  }
  func.func @transform_0(%arg0: i32, %arg1: i32) -> (i32, i32) {
    %c0_i32 = arith.constant 0 : i32
    return %arg0, %arg1 : i32, i32
  }
  func.func @transform_1(%arg0: i32, %arg1: i32) -> (i32, i32) {
    %c0_i32 = arith.constant 0 : i32
    %c0_i32_0 = arith.constant 0 : i32
    return %arg1, %c0_i32 : i32, i32
  }
  func.func @transform_2(%arg0: i32, %arg1: i32) -> (i32, i32) {
    %c0_i32 = arith.constant 0 : i32
    %c0_i32_0 = arith.constant 0 : i32
    return %arg0, %c0_i32 : i32, i32
  }
  func.func @transform_3(%arg0: i32, %arg1: i32) -> (i32, i32) {
    %c0_i32 = arith.constant 0 : i32
    %c0_i32_0 = arith.constant 0 : i32
    %c0_i32_1 = arith.constant 0 : i32
    return %c0_i32, %c0_i32_0 : i32, i32
  }
  func.func @transform_4(%arg0: i32, %arg1: i32) -> (i32, i32) {
    %c0_i32 = arith.constant 0 : i32
    %c0_i32_0 = arith.constant 0 : i32
    %c0_i32_1 = arith.constant 0 : i32
    return %c0_i32, %c0_i32_0 : i32, i32
  }
  func.func @transform_5(%arg0: i32, %arg1: i32) -> (i32, i32) {
    %c0_i32 = arith.constant 0 : i32
    %c0_i32_0 = arith.constant 0 : i32
    %c0_i32_1 = arith.constant 0 : i32
    return %c0_i32, %c0_i32_0 : i32, i32
  }
  func.func @transform_6(%arg0: i32, %arg1: i32) -> (i32, i32) {
    %c0_i32 = arith.constant 0 : i32
    %c0_i32_0 = arith.constant 0 : i32
    return %arg0, %c0_i32 : i32, i32
  }
}

module attributes {stable_mosaic.version = 11 : i64} {
  func.func @edge_mlp_kernel(%arg0: i32, %arg1: memref<16x1xi32, #tpu.memory_space<vmem>>, %arg2: memref<16x1xi32, #tpu.memory_space<vmem>>, %arg3: memref<16x1xf32, #tpu.memory_space<vmem>>, %arg4: memref<8x32xf32, #tpu.memory_space<vmem>>, %arg5: memref<1x16xf32, #tpu.memory_space<vmem>>, %arg6: memref<1x16xf32, #tpu.memory_space<vmem>>, %arg7: memref<16x2xf32, #tpu.memory_space<vmem>>, %arg8: memref<1x2xf32, #tpu.memory_space<vmem>>, %arg9: memref<16x2xf32, #tpu.memory_space<vmem>>) attributes {dimension_semantics = [#tpu.dimension_semantics<parallel>], iteration_bounds = array<i64: 1>, scalar_prefetch = 0 : i64, scratch_operands = 0 : i64, tpu.core_type = #tpu.core_type<tc>, window_params = [{transform_indices = @transform_0, window_bounds = array<i64: 16, 1>}, {transform_indices = @transform_1, window_bounds = array<i64: 16, 1>}, {transform_indices = @transform_2, window_bounds = array<i64: 16, 1>}, {pipeline_mode = #tpu.pipeline_mode<synchronous>, transform_indices = @transform_3, window_bounds = array<i64: 8, 32>}, {pipeline_mode = #tpu.pipeline_mode<synchronous>, transform_indices = @transform_4, window_bounds = array<i64: 1, 16>}, {pipeline_mode = #tpu.pipeline_mode<synchronous>, transform_indices = @transform_5, window_bounds = array<i64: 1, 16>}, {pipeline_mode = #tpu.pipeline_mode<synchronous>, transform_indices = @transform_6, window_bounds = array<i64: 16, 2>}, {pipeline_mode = #tpu.pipeline_mode<synchronous>, transform_indices = @transform_7, window_bounds = array<i64: 1, 2>}, {transform_indices = @transform_8, window_bounds = array<i64: 16, 2>}]} {
    %c0 = arith.constant 0 : index
    %c0_0 = arith.constant 0 : index
    %0 = vector.load %arg1[%c0, %c0_0] : memref<16x1xi32, #tpu.memory_space<vmem>>, vector<16x1xi32>
    %c0_1 = arith.constant 0 : index
    %c0_2 = arith.constant 0 : index
    %1 = vector.load %arg2[%c0_1, %c0_2] : memref<16x1xi32, #tpu.memory_space<vmem>>, vector<16x1xi32>
    %2 = tpu.iota {dimensions = array<i32: 1>} : vector<16x8xi32>
    %3 = vector.broadcast %0 : vector<16x1xi32> to vector<16x8xi32>
    %4 = arith.cmpi eq, %2, %3 : vector<16x8xi32>
    %5 = arith.extui %4 : vector<16x8xi1> to vector<16x8xi32>
    %6 = arith.sitofp %5 : vector<16x8xi32> to vector<16x8xf32>
    %7 = vector.broadcast %1 : vector<16x1xi32> to vector<16x8xi32>
    %8 = arith.cmpi eq, %2, %7 : vector<16x8xi32>
    %9 = arith.extui %8 : vector<16x8xi1> to vector<16x8xi32>
    %10 = arith.sitofp %9 : vector<16x8xi32> to vector<16x8xf32>
    %c0_3 = arith.constant 0 : index
    %c0_4 = arith.constant 0 : index
    %11 = vector.load %arg4[%c0_3, %c0_4] : memref<8x32xf32, #tpu.memory_space<vmem>>, vector<8x32xf32>
    %12 = vector.extract_strided_slice %11 {offsets = [0, 0], sizes = [8, 16], strides = [1, 1]} : vector<8x32xf32> to vector<8x16xf32>
    %cst = arith.constant dense<0.000000e+00> : vector<16x16xf32>
    %13 = tpu.matmul %6, %12, %cst {dimension_numbers = #tpu.dot_dimension_numbers<[1], [0], [0], [1], [0, 0, 1, 1], [], []>} : vector<16x8xf32>, vector<8x16xf32>, vector<16x16xf32> -> vector<16x16xf32>
    %14 = vector.extract_strided_slice %11 {offsets = [0, 16], sizes = [8, 16], strides = [1, 1]} : vector<8x32xf32> to vector<8x16xf32>
    %cst_5 = arith.constant dense<0.000000e+00> : vector<16x16xf32>
    %15 = tpu.matmul %10, %14, %cst_5 {dimension_numbers = #tpu.dot_dimension_numbers<[1], [0], [0], [1], [0, 0, 1, 1], [], []>} : vector<16x8xf32>, vector<8x16xf32>, vector<16x16xf32> -> vector<16x16xf32>
    %16 = arith.addf %13, %15 : vector<16x16xf32>
    %c0_6 = arith.constant 0 : index
    %c0_7 = arith.constant 0 : index
    %17 = vector.load %arg3[%c0_6, %c0_7] : memref<16x1xf32, #tpu.memory_space<vmem>>, vector<16x1xf32>
    %c0_8 = arith.constant 0 : index
    %c0_9 = arith.constant 0 : index
    %18 = vector.load %arg5[%c0_8, %c0_9] : memref<1x16xf32, #tpu.memory_space<vmem>>, vector<1x16xf32>
    %19 = vector.broadcast %17 : vector<16x1xf32> to vector<16x16xf32>
    %20 = vector.broadcast %18 : vector<1x16xf32> to vector<16x16xf32>
    %21 = arith.mulf %19, %20 : vector<16x16xf32>
    %22 = arith.addf %16, %21 : vector<16x16xf32>
    %c0_10 = arith.constant 0 : index
    %c0_11 = arith.constant 0 : index
    %23 = vector.load %arg6[%c0_10, %c0_11] : memref<1x16xf32, #tpu.memory_space<vmem>>, vector<1x16xf32>
    %24 = vector.broadcast %23 : vector<1x16xf32> to vector<16x16xf32>
    %25 = arith.addf %22, %24 : vector<16x16xf32>
    %cst_12 = arith.constant 0.000000e+00 : f32
    %26 = vector.broadcast %cst_12 : f32 to vector<16x16xf32>
    %27 = arith.maximumf %25, %26 : vector<16x16xf32>
    %c0_13 = arith.constant 0 : index
    %c0_14 = arith.constant 0 : index
    %28 = vector.load %arg7[%c0_13, %c0_14] : memref<16x2xf32, #tpu.memory_space<vmem>>, vector<16x2xf32>
    %cst_15 = arith.constant dense<0.000000e+00> : vector<16x2xf32>
    %29 = tpu.matmul %27, %28, %cst_15 {dimension_numbers = #tpu.dot_dimension_numbers<[1], [0], [0], [1], [0, 0, 1, 1], [], []>} : vector<16x16xf32>, vector<16x2xf32>, vector<16x2xf32> -> vector<16x2xf32>
    %c0_16 = arith.constant 0 : index
    %c0_17 = arith.constant 0 : index
    %30 = vector.load %arg8[%c0_16, %c0_17] : memref<1x2xf32, #tpu.memory_space<vmem>>, vector<1x2xf32>
    %31 = vector.broadcast %30 : vector<1x2xf32> to vector<16x2xf32>
    %32 = arith.addf %29, %31 : vector<16x2xf32>
    %c0_18 = arith.constant 0 : index
    %c0_19 = arith.constant 0 : index
    %33 = vector.load %arg9[%c0_18, %c0_19] : memref<16x2xf32, #tpu.memory_space<vmem>>, vector<16x2xf32>
    tpu.vector_store %arg9[%c0_18, %c0_19], %32 {strides = array<i32>} : memref<16x2xf32, #tpu.memory_space<vmem>>, vector<16x2xf32>,
    return
  }
  func.func @transform_0(%arg0: i32) -> (i32, i32) {
    %c0_i32 = arith.constant 0 : i32
    %c0_i32_0 = arith.constant 0 : i32
    return %arg0, %c0_i32 : i32, i32
  }
  func.func @transform_1(%arg0: i32) -> (i32, i32) {
    %c0_i32 = arith.constant 0 : i32
    %c0_i32_0 = arith.constant 0 : i32
    return %arg0, %c0_i32 : i32, i32
  }
  func.func @transform_2(%arg0: i32) -> (i32, i32) {
    %c0_i32 = arith.constant 0 : i32
    %c0_i32_0 = arith.constant 0 : i32
    return %arg0, %c0_i32 : i32, i32
  }
  func.func @transform_3(%arg0: i32) -> (i32, i32) {
    %c0_i32 = arith.constant 0 : i32
    %c0_i32_0 = arith.constant 0 : i32
    %c0_i32_1 = arith.constant 0 : i32
    return %c0_i32, %c0_i32_0 : i32, i32
  }
  func.func @transform_4(%arg0: i32) -> (i32, i32) {
    %c0_i32 = arith.constant 0 : i32
    %c0_i32_0 = arith.constant 0 : i32
    %c0_i32_1 = arith.constant 0 : i32
    return %c0_i32, %c0_i32_0 : i32, i32
  }
  func.func @transform_5(%arg0: i32) -> (i32, i32) {
    %c0_i32 = arith.constant 0 : i32
    %c0_i32_0 = arith.constant 0 : i32
    %c0_i32_1 = arith.constant 0 : i32
    return %c0_i32, %c0_i32_0 : i32, i32
  }
  func.func @transform_6(%arg0: i32) -> (i32, i32) {
    %c0_i32 = arith.constant 0 : i32
    %c0_i32_0 = arith.constant 0 : i32
    %c0_i32_1 = arith.constant 0 : i32
    return %c0_i32, %c0_i32_0 : i32, i32
  }
  func.func @transform_7(%arg0: i32) -> (i32, i32) {
    %c0_i32 = arith.constant 0 : i32
    %c0_i32_0 = arith.constant 0 : i32
    %c0_i32_1 = arith.constant 0 : i32
    return %c0_i32, %c0_i32_0 : i32, i32
  }
  func.func @transform_8(%arg0: i32) -> (i32, i32) {
    %c0_i32 = arith.constant 0 : i32
    %c0_i32_0 = arith.constant 0 : i32
    return %arg0, %c0_i32 : i32, i32
  }
}

</mosaic_0001>

<bundles_post_ra>
// kernel: mul.2
= control target key start
LH: loop header
LB: loop body
LE: loop exit
PB: predicated region body
PF: predicated region fallthrough
CT: control target
= control target key end

     0   :  { %s34_s0 = inlined_call_operand.vmem [shape: f32[14], index: 0, kind: input, shape index: {}]   ;;  %s35_s1 = inlined_call_operand.vmem [shape: f32[14], index: 1, kind: input, shape index: {}]   ;;  %s36_s2 = inlined_call_operand.vmem [shape: f32[14], index: 2, kind: output, shape index: {}]  }
   0x1   :  { %v3_v0 = vld [vmem:[%s34_s0] sm:$0x1] }
   0x2   :  { %v4_v1 = vld [vmem:[%s35_s1] sm:$0x1] }
   0x3   :  { %v7_v2 = vmul.f32 %v4_v1, %v3_v0 }
   0x5   :  { %9 = vst [vmem:[%s36_s2] sm:$0x1] %v7_v2 }

// kernel: edgenet_forward.3
= control target key start
LH: loop header
LB: loop body
LE: loop exit
PB: predicated region body
PF: predicated region fallthrough
CT: control target
= control target key end

     0   :  { %10 = vsyncpa [#allocation4], 0  ;;  %s564_s0 = inlined_call_operand.hbm [shape: f32[8,8], index: 0, kind: input, shape index: {}]   ;;  %s565_s1 = inlined_call_operand.hbm [shape: f32[8,4], index: 1, kind: input, shape index: {}]   ;;  %s566_s2 = inlined_call_operand.hbm [shape: f32[8,1], index: 2, kind: input, shape index: {}]   ;;  %s567_s3 = inlined_call_operand.hbm [shape: f32[4,16], index: 3, kind: input, shape index: {}]   ;;  %s568_s4 = inlined_call_operand.hbm [shape: f32[1,16], index: 4, kind: input, shape index: {}]   ;;  %s569_s5 = inlined_call_operand.hbm [shape: f32[8,16], index: 5, kind: output, shape index: {}]  }
   0x1   :  { %11 = vsyncpa [#allocation7], 0 }
   0x2   :  { %12 = vsyncpa [#allocation10], 0 }
   0x3   :  { %13 = vsyncpa [#allocation5], 0  ;;  %s450_s18 = smov [#allocation6]   ;;  %s451_s20 = smov [#allocation9]  }
   0x4   :  { %s30_s19 = sshll.u32 %s450_s18, 4  ;;  %s50_s21 = sshll.u32 %s451_s20, 4  ;;  %s31_s19 = int_to_ptr.vmem [resolvable:$true] %s30_s19  ;;  %s51_s21 = int_to_ptr.vmem [resolvable:$true] %s50_s21 }
   0x5   :  { %s310_s24 = scalar_lea.hbm %s565_s1, 128 }
   0x6   :  { %p311_p0 = scmp.ne.s32.totalorder %s565_s1, %s310_s24  ;;  %p314_p1 = scmp.lt.u32.totalorder %s310_s24, %s565_s1 }
   0x8   :  { %p316_p2 = pnand %p314_p1, %p311_p0 }
   0xa   :  { %319 = shalt.err (!%p316_p2)
}
   0xb   :  { %s320_s29 = scalar_lea.vmem %s31_s19, 128  ;;  %p325_p4 = scmp.lt.s32.totalorder %s31_s19, %s31_s19 }
   0xc   :  { %p321_p3 = scmp.ne.s32.totalorder %s31_s19, %s320_s29  ;;  %p326_p5 = scmp.lt.s32.totalorder %s320_s29, %s320_s29 }
   0xe   :  { %p327_p6 = por %p326_p5, %p325_p4 }
  0x10   :  { %p328_p7 = pnand %p327_p6, %p321_p3 }
  0x12   :  { %331 = shalt.err (!%p328_p7)
}
  0x13   :  { %33 = dma.hbm_to_vmem [thread:$0]  %s565_s1, 128, %s31_s19, [#allocation7]  }
  0x14   :  { %s332_s9 = scalar_lea.hbm %s567_s3, 64 }
  0x15   :  { %p333_p8 = scmp.ne.s32.totalorder %s567_s3, %s332_s9  ;;  %p336_p9 = scmp.lt.u32.totalorder %s332_s9, %s567_s3 }
  0x17   :  { %p338_p10 = pnand %p336_p9, %p333_p8 }
  0x19   :  { %341 = shalt.err (!%p338_p10)
}
  0x1a   :  { %s342_s14 = scalar_lea.vmem %s51_s21, 64  ;;  %p347_p12 = scmp.lt.s32.totalorder %s51_s21, %s51_s21 }
  0x1b   :  { %p343_p11 = scmp.ne.s32.totalorder %s51_s21, %s342_s14  ;;  %p348_p13 = scmp.lt.s32.totalorder %s342_s14, %s342_s14 }
  0x1d   :  { %p349_p0 = por %p348_p13, %p347_p12 }
  0x1f   :  { %p350_p1 = pnand %p349_p0, %p343_p11 }
  0x21   :  { %353 = shalt.err (!%p350_p1)
}
  0x22   :  { %53 = dma.hbm_to_vmem [thread:$0]  %s567_s3, 64, %s51_s21, [#allocation10]  }
  0x23   :  { %s452_s16 = smov [#allocation3]   ;;  %s453_s18 = smov [#allocation8]  }
  0x24   :  { %s20_s17 = sshll.u32 %s452_s16, 4  ;;  %s40_s19 = sshll.u32 %s453_s18, 4  ;;  %s21_s17 = int_to_ptr.vmem [resolvable:$true] %s20_s17  ;;  %s41_s19 = int_to_ptr.vmem [resolvable:$true] %s40_s19 }
  0x25   :  { %s354_s23 = scalar_lea.hbm %s564_s0, 128 }
  0x26   :  { %p355_p2 = scmp.ne.s32.totalorder %s564_s0, %s354_s23  ;;  %p358_p3 = scmp.lt.u32.totalorder %s354_s23, %s564_s0 }
  0x28   :  { %p360_p4 = pnand %p358_p3, %p355_p2 }
  0x2a   :  { %363 = shalt.err (!%p360_p4)
}
  0x2b   :  { %s364_s3 = scalar_lea.vmem %s21_s17, 128  ;;  %p369_p6 = scmp.lt.s32.totalorder %s21_s17, %s21_s17 }
  0x2c   :  { %p365_p5 = scmp.ne.s32.totalorder %s21_s17, %s364_s3  ;;  %p370_p7 = scmp.lt.s32.totalorder %s364_s3, %s364_s3 }
  0x2e   :  { %p371_p8 = por %p370_p7, %p369_p6 }
  0x30   :  { %p372_p9 = pnand %p371_p8, %p365_p5 }
  0x32   :  { %375 = shalt.err (!%p372_p9)
}
  0x33   :  { %23 = dma.hbm_to_vmem [thread:$0]  %s564_s0, 128, %s21_s17, [#allocation4]  }
  0x34   :  { %s376_s6 = scalar_lea.hbm %s566_s2, 128 }
  0x35   :  { %p377_p10 = scmp.ne.s32.totalorder %s566_s2, %s376_s6  ;;  %p380_p11 = scmp.lt.u32.totalorder %s376_s6, %s566_s2 }
  0x37   :  { %p382_p12 = pnand %p380_p11, %p377_p10 }
  0x39   :  { %385 = shalt.err (!%p382_p12)
}
  0x3a   :  { %s386_s11 = scalar_lea.vmem %s41_s19, 128  ;;  %p391_p0 = scmp.lt.s32.totalorder %s41_s19, %s41_s19 }
  0x3b   :  { %p387_p13 = scmp.ne.s32.totalorder %s41_s19, %s386_s11  ;;  %p392_p1 = scmp.lt.s32.totalorder %s386_s11, %s386_s11 }
  0x3d   :  { %p393_p2 = por %p392_p1, %p391_p0 }
  0x3f   :  { %p394_p3 = pnand %p393_p2, %p387_p13 }
  0x41   :  { %397 = shalt.err (!%p394_p3)
}
  0x42   :  { %43 = dma.hbm_to_vmem [thread:$0]  %s566_s2, 128, %s41_s19, [#allocation7]  }
  0x43   :  { %s454_s13 = smov [#allocation11]   ;;  %s398_s16 = scalar_lea.hbm %s568_s4, 16 }
  0x44   :  { %s60_s14 = sshll.u32 %s454_s13, 4  ;;  %p399_p4 = scmp.ne.s32.totalorder %s568_s4, %s398_s16  ;;  %s61_s14 = int_to_ptr.vmem [resolvable:$true] %s60_s14 }
  0x45   :  { %p402_p5 = scmp.lt.u32.totalorder %s398_s16, %s568_s4 }
  0x47   :  { %p404_p6 = pnand %p402_p5, %p399_p4 }
  0x49   :  { %407 = shalt.err (!%p404_p6)
}
  0x4a   :  { %s408_s23 = scalar_lea.vmem %s61_s14, 16  ;;  %s412_s2 = scalar_lea.vmem %s61_s14, 32 }
  0x4b   :  { %p409_p7 = scmp.ne.s32.totalorder %s61_s14, %s408_s23  ;;  %p413_p8 = scmp.lt.s32.totalorder %s61_s14, %s61_s14 }
  0x4c   :  { %p414_p9 = scmp.lt.s32.totalorder %s412_s2, %s408_s23 }
  0x4e   :  { %p415_p10 = por %p414_p9, %p413_p8 }
  0x50   :  { %p416_p11 = pnand %p415_p10, %p409_p7 }
  0x52   :  { %419 = shalt.err (!%p416_p11)
}
  0x53   :  { %63 = dma.hbm_to_vmem [thread:$0]  %s568_s4, 16, %s61_s14, [#allocation10]  }
  0x54   :  { %442 = dma.done.wait [#allocation4], 128  }
  0x55   :  { %443 = vsyncadd [#allocation4], 4294967168 }
  0x56   :  { %444 = dma.done.wait [#allocation7], 256  }
  0x57   :  { %445 = vsyncadd [#allocation7], 4294967040 }
  0x58   :  { %446 = dma.done.wait [#allocation10], 80  }
  0x59   :  { %447 = vsyncadd [#allocation10], 4294967216  ;;  %v455_v0 = vmov 0.0   ;;  %vm456_vm0 = vmmov 0   ;;  %vm91_vm1 = vcmask 1043456   ;;  %vm87_vm2 = vcmask 31744  }
  0x5a   :  { %290 = vmatprep.subr.mxu0 %v455_v0  ;;  %292 = vmatprep.mubr.msk.f32.mxu0 %vm456_vm0, %v455_v0  ;;  %v86_v1 = vld [vmem:[#allocation9] sm:$0xf]  ;;  %v85_v2 = vld [vmem:[#allocation6] sm:$0xff]  ;;  %v248_v3 = vld [vmem:[#allocation8] sm:$0xff]  ;;  %vm83_vm3 = vcmask 130048   ;;  %v457_v4 = vmov 0  }
  0x5b   :  { %295 = vmatprep.subr.mxu1 %v455_v0  ;;  %297 = vmatprep.mubr.msk.f32.mxu1 %vm456_vm0, %v455_v0  ;;  %84 = vst.msk [vmem:[#allocation2] sm:$0xff] %vm83_vm3, %v455_v0  ;;  %v166_v5 = vld [vmem:[#allocation3] sm:$0xff]  ;;  %vm167_vm4 = vcmask 64512   ;;  %v285_v12 = vld [vmem:[#allocation11] ss:$0 sm:$0xff]  ;;  %s458_s4 = smov [#allocation12]  }
  0x5c   :  { %291 = vmatpush3.msk.msra.mxu0 %vm91_vm1, %v86_v1  ;;  %309 = vset.pattern.permute.xlu0 %v457_v4  ;;  %s271_s25 = sshll.u32 %s458_s4, 4  ;;  %s272_s25 = int_to_ptr.vmem [resolvable:$true] %s271_s25 }
  0x5d   :  { %293 = vmatmul.mubr.msk.f32.vlgmr.msra.gmra.mrb[0].mxu0 %vm87_vm2, %v85_v2  ;;  %252 = vperm.xlu0 %309, %v248_v3   ;;  %s420_s26 = scalar_lea.vmem %s272_s25, 128  ;;  %p425_p13 = scmp.lt.s32.totalorder %s272_s25, %s272_s25 }
  0x5e   :  { %p421_p12 = scmp.ne.s32.totalorder %s272_s25, %s420_s26  ;;  %p426_p0 = scmp.lt.s32.totalorder %s420_s26, %s420_s26 }
  0x60   :  { %p427_p1 = por %p426_p0, %p425_p13 }
  0x62   :  { %v165_v8 = vld [vmem:[#allocation2] sm:$0xff]  ;;  %p428_p2 = pnand %p427_p1, %p421_p12 }
  0xdc   :  { %v253_v13 = vpop.permute.xlu0 %252 }
  0xdd   :  { %v261_v14 = vmul.f32 %v285_v12, %v253_v13 }
 0x130   :  { %v161_v6 = vpop.f32.mrb[0].mxu0 }
 0x131   :  { %v294_v7 = vpop.f32.mrb[1].mxu0  ;;  %296 = vmatpush3.msra.mxu1 %v161_v6 }
 0x132   :  { %298 = vmatmul.mubr.msk.f32.vlgmr.msra.gmra.mrb[0].mxu1 %vm167_vm4, %v166_v5 }
 0x205   :  { %v237_v9 = vpop.f32.mrb[0].mxu1 }
 0x206   :  { %v241_v10 = vadd.f32 %v237_v9, %v165_v8  ;;  %v299_v11 = vpop.f32.mrb[1].mxu1 }
 0x208   :  { %243 = vst.msk [vmem:[#allocation2] sm:$0xff] %vm83_vm3, %v241_v10 }
 0x20f   :  { %v247_v15 = vld [vmem:[#allocation2] sm:$0xff] }
 0x210   :  { %v262_v16 = vadd.f32 %v261_v14, %v247_v15 }
 0x212   :  { %v263_v17 = vmax.f32 %v262_v16, 0.0 }
 0x214   :  { %264 = vst.msk [vmem:[#allocation12] sm:$0xff] %vm83_vm3, %v263_v17 }
 0x215   :  { %431 = shalt.err (!%p428_p2)
}
 0x216   :  { %s432_s21 = scalar_lea.hbm %s569_s5, 128 }
 0x217   :  { %p433_p3 = scmp.ne.s32.totalorder %s569_s5, %s432_s21  ;;  %p436_p4 = scmp.lt.u32.totalorder %s432_s21, %s569_s5 }
 0x219   :  { %p438_p5 = pnand %p436_p4, %p433_p3 }
 0x21b   :  { %441 = shalt.err (!%p438_p5)
}
 0x21c   :  { %274 = dma.vmem_to_hbm [thread:$0]  %s272_s25, 128, %s569_s5, [#allocation5]  }
 0x21d   :  { %448 = dma.done.wait [#allocation5], 128  }
 0x21e   :  { %449 = vsyncadd [#allocation5], 4294967168 }
 0x21f   :  { %278 = vsyncpa [#allocation4], 1 }
 0x220   :  { %279 = vsyncpa [#allocation7], 1 }
 0x221   :  { %280 = vsyncpa [#allocation10], 1 }
 0x222   :  { %281 = vsyncpa [#allocation5], 1 }

// kernel: edgenet_forward.4
= control target key start
LH: loop header
LB: loop body
LE: loop exit
PB: predicated region body
PF: predicated region fallthrough
CT: control target
= control target key end

     0   :  { %11 = vsyncpa [#allocation4], 0  ;;  %s748_s0 = inlined_call_operand.hbm [shape: f32[8,8], index: 0, kind: input, shape index: {}]   ;;  %s749_s1 = inlined_call_operand.hbm [shape: f32[8,16], index: 1, kind: input, shape index: {}]   ;;  %s750_s2 = inlined_call_operand.hbm [shape: f32[8,1], index: 2, kind: input, shape index: {}]   ;;  %s751_s3 = inlined_call_operand.hbm [shape: f32[16,16], index: 3, kind: input, shape index: {}]   ;;  %s752_s4 = inlined_call_operand.hbm [shape: f32[1,16], index: 4, kind: input, shape index: {}]   ;;  %s753_s5 = inlined_call_operand.hbm [shape: f32[16,32], index: 5, kind: input, shape index: {}]   ;;  %s754_s6 = inlined_call_operand.hbm [shape: f32[8,32], index: 6, kind: output, shape index: {}]  }
   0x1   :  { %12 = vsyncpa [#allocation7], 0 }
   0x2   :  { %13 = vsyncpa [#allocation10], 0 }
   0x3   :  { %14 = vsyncpa [#allocation13], 0 }
   0x4   :  { %15 = vsyncpa [#allocation5], 0  ;;  %s589_s21 = smov [#allocation6]   ;;  %s590_s23 = smov [#allocation9]  }
   0x5   :  { %s32_s22 = sshll.u32 %s589_s21, 4  ;;  %s51_s24 = sshll.u32 %s590_s23, 4  ;;  %s33_s22 = int_to_ptr.vmem [resolvable:$true] %s32_s22  ;;  %s637_s24 = int_to_ptr.vmem [resolvable:$true] %s51_s24 }
   0x6   :  { %s425_s27 = scalar_lea.hbm %s749_s1, 128 }
   0x7   :  { %p426_p0 = scmp.ne.s32.totalorder %s749_s1, %s425_s27  ;;  %p429_p1 = scmp.lt.u32.totalorder %s425_s27, %s749_s1 }
   0x9   :  { %p431_p2 = pnand %p429_p1, %p426_p0 }
   0xb   :  { %434 = shalt.err (!%p431_p2)
}
   0xc   :  { %s435_s8 = scalar_lea.vmem %s33_s22, 128  ;;  %p440_p4 = scmp.lt.s32.totalorder %s33_s22, %s33_s22 }
   0xd   :  { %p436_p3 = scmp.ne.s32.totalorder %s33_s22, %s435_s8  ;;  %p441_p5 = scmp.lt.s32.totalorder %s435_s8, %s435_s8 }
   0xf   :  { %p442_p6 = por %p441_p5, %p440_p4 }
  0x11   :  { %p443_p7 = pnand %p442_p6, %p436_p3 }
  0x13   :  { %446 = shalt.err (!%p443_p7)
}
  0x14   :  { %35 = dma.hbm_to_vmem [thread:$0]  %s749_s1, 128, %s33_s22, [#allocation7]  }
  0x15   :  { %s447_s13 = scalar_lea.hbm %s751_s3, 256 }
  0x16   :  { %p448_p8 = scmp.ne.s32.totalorder %s751_s3, %s447_s13  ;;  %p451_p9 = scmp.lt.u32.totalorder %s447_s13, %s751_s3 }
  0x18   :  { %p453_p10 = pnand %p451_p9, %p448_p8 }
  0x1a   :  { %456 = shalt.err (!%p453_p10)
}
  0x1b   :  { %s457_s18 = scalar_lea.vmem %s637_s24, 256  ;;  %p462_p12 = scmp.lt.s32.totalorder %s637_s24, %s637_s24 }
  0x1c   :  { %p458_p11 = scmp.ne.s32.totalorder %s637_s24, %s457_s18  ;;  %p463_p13 = scmp.lt.s32.totalorder %s457_s18, %s457_s18 }
  0x1e   :  { %p464_p0 = por %p463_p13, %p462_p12 }
  0x20   :  { %p465_p1 = pnand %p464_p0, %p458_p11 }
  0x22   :  { %468 = shalt.err (!%p465_p1)
}
  0x23   :  { %s591_s1 = smov 128   ;;  %s592_s19 = smov 8  }
  0x24   :  { %57 = dma.hbm_to_vmem [thread:$0]  %s751_s3, 256, %s637_s24, [#allocation10], %s591_s1, %s591_s1, %s592_s19  }
  0x25   :  { %s593_s22 = smov [#allocation3]   ;;  %s594_s25 = smov [#allocation8]  }
  0x26   :  { %s22_s23 = sshll.u32 %s593_s22, 4  ;;  %s42_s26 = sshll.u32 %s594_s25, 4  ;;  %s23_s23 = int_to_ptr.vmem [resolvable:$true] %s22_s23  ;;  %s43_s26 = int_to_ptr.vmem [resolvable:$true] %s42_s26 }
  0x27   :  { %s469_s29 = scalar_lea.hbm %s748_s0, 128 }
  0x28   :  { %p470_p2 = scmp.ne.s32.totalorder %s748_s0, %s469_s29  ;;  %p473_p3 = scmp.lt.u32.totalorder %s469_s29, %s748_s0 }
  0x2a   :  { %p475_p4 = pnand %p473_p3, %p470_p2 }
  0x2c   :  { %478 = shalt.err (!%p475_p4)
}
  0x2d   :  { %s479_s3 = scalar_lea.vmem %s23_s23, 128  ;;  %p484_p6 = scmp.lt.s32.totalorder %s23_s23, %s23_s23 }
  0x2e   :  { %p480_p5 = scmp.ne.s32.totalorder %s23_s23, %s479_s3  ;;  %p485_p7 = scmp.lt.s32.totalorder %s479_s3, %s479_s3 }
  0x30   :  { %p486_p8 = por %p485_p7, %p484_p6 }
  0x32   :  { %p487_p9 = pnand %p486_p8, %p480_p5 }
  0x34   :  { %490 = shalt.err (!%p487_p9)
}
  0x35   :  { %25 = dma.hbm_to_vmem [thread:$0]  %s748_s0, 128, %s23_s23, [#allocation4]  }
  0x36   :  { %s491_s13 = scalar_lea.hbm %s750_s2, 128 }
  0x37   :  { %p492_p10 = scmp.ne.s32.totalorder %s750_s2, %s491_s13  ;;  %p495_p11 = scmp.lt.u32.totalorder %s491_s13, %s750_s2 }
  0x39   :  { %p497_p12 = pnand %p495_p11, %p492_p10 }
  0x3b   :  { %500 = shalt.err (!%p497_p12)
}
  0x3c   :  { %s501_s18 = scalar_lea.vmem %s43_s26, 128  ;;  %p506_p0 = scmp.lt.s32.totalorder %s43_s26, %s43_s26 }
  0x3d   :  { %p502_p13 = scmp.ne.s32.totalorder %s43_s26, %s501_s18  ;;  %p507_p1 = scmp.lt.s32.totalorder %s501_s18, %s501_s18 }
  0x3f   :  { %p508_p2 = por %p507_p1, %p506_p0 }
  0x41   :  { %p509_p3 = pnand %p508_p2, %p502_p13 }
  0x43   :  { %512 = shalt.err (!%p509_p3)
}
  0x44   :  { %45 = dma.hbm_to_vmem [thread:$0]  %s750_s2, 128, %s43_s26, [#allocation7]  }
  0x45   :  { %s595_s21 = smov [#allocation11]   ;;  %s596_s23 = smov [#allocation12]  }
  0x46   :  { %s64_s22 = sshll.u32 %s595_s21, 4  ;;  %s73_s25 = sshll.u32 %s596_s23, 4  ;;  %s65_s22 = int_to_ptr.vmem [resolvable:$true] %s64_s22  ;;  %s695_s25 = int_to_ptr.vmem [resolvable:$true] %s73_s25 }
  0x47   :  { %s513_s29 = scalar_lea.hbm %s752_s4, 16 }
  0x48   :  { %p514_p4 = scmp.ne.s32.totalorder %s752_s4, %s513_s29  ;;  %p517_p5 = scmp.lt.u32.totalorder %s513_s29, %s752_s4 }
  0x4a   :  { %p519_p6 = pnand %p517_p5, %p514_p4 }
  0x4c   :  { %522 = shalt.err (!%p519_p6)
}
  0x4d   :  { %s523_s2 = scalar_lea.vmem %s65_s22, 16  ;;  %s527_s26 = scalar_lea.vmem %s65_s22, 32 }
  0x4e   :  { %p524_p7 = scmp.ne.s32.totalorder %s65_s22, %s523_s2  ;;  %p528_p8 = scmp.lt.s32.totalorder %s65_s22, %s65_s22 }
  0x4f   :  { %p529_p9 = scmp.lt.s32.totalorder %s527_s26, %s523_s2 }
  0x51   :  { %p530_p10 = por %p529_p9, %p528_p8 }
  0x53   :  { %p531_p11 = pnand %p530_p10, %p524_p7 }
  0x55   :  { %534 = shalt.err (!%p531_p11)
}
  0x56   :  { %67 = dma.hbm_to_vmem [thread:$0]  %s752_s4, 16, %s65_s22, [#allocation10]  }
  0x57   :  { %s535_s12 = scalar_lea.hbm %s753_s5, 256 }
  0x58   :  { %p536_p12 = scmp.ne.s32.totalorder %s753_s5, %s535_s12  ;;  %p539_p13 = scmp.lt.u32.totalorder %s535_s12, %s753_s5 }
  0x5a   :  { %p541_p0 = pnand %p539_p13, %p536_p12 }
  0x5c   :  { %544 = shalt.err (!%p541_p0)
}
  0x5d   :  { %s545_s17 = scalar_lea.vmem %s695_s25, 256  ;;  %p550_p2 = scmp.lt.s32.totalorder %s695_s25, %s695_s25 }
  0x5e   :  { %p546_p1 = scmp.ne.s32.totalorder %s695_s25, %s545_s17  ;;  %p551_p3 = scmp.lt.s32.totalorder %s545_s17, %s545_s17 }
  0x60   :  { %p552_p4 = por %p551_p3, %p550_p2 }
  0x62   :  { %p553_p5 = pnand %p552_p4, %p546_p1 }
  0x64   :  { %556 = shalt.err (!%p553_p5)
}
  0x65   :  { %79 = dma.hbm_to_vmem [thread:$0]  %s753_s5, 256, %s695_s25, [#allocation13], %s591_s1, %s591_s1, %s592_s19  }
  0x66   :  { %579 = dma.done.wait [#allocation4], 128  }
  0x67   :  { %580 = vsyncadd [#allocation4], 4294967168 }
  0x68   :  { %581 = dma.done.wait [#allocation7], 256  }
  0x69   :  { %582 = vsyncadd [#allocation7], 4294967040 }
  0x6a   :  { %583 = dma.done.wait [#allocation10], 272  }
  0x6b   :  { %584 = vsyncadd [#allocation10], 4294967024 }
  0x6c   :  { %585 = dma.done.wait [#allocation13], 256  }
  0x6d   :  { %586 = vsyncadd [#allocation13], 4294967040  ;;  %vm102_vm0 = vcmask 130048   ;;  %v597_v0 = vmov 0.0|0.0   ;;  %vm598_vm1 = vmmov 0   ;;  %v599_v1 = vmov 0.0  }
  0x6e   :  { %405 = vmatprep.subr.bf16.mxu0 %v597_v0  ;;  %390 = vmatprep.mubr.msk.f32.mxu0 %vm598_vm1, %v599_v1  ;;  %103 = vst.msk [vmem:[#allocation2] sm:$0xff] %vm102_vm0, %v599_v1  ;;  %v105_v2 = vld [vmem:[#allocation9] sm:$0xff]  ;;  %v106_v3 = vld [vmem:[#allocation9 + $0x8] sm:$0xff]  ;;  %v104_v5 = vld [vmem:[#allocation6] sm:$0xff]  ;;  %v600_v7 = vmov 0   ;;  %vm183_vm2 = vcmask 64512  }
  0x6f   :  { %393 = vmatprep.subr.mxu1 %v599_v1  ;;  %395 = vmatprep.mubr.msk.f32.mxu1 %vm598_vm1, %v599_v1  ;;  %v406_v4 = vpack.c.bf16 %v106_v3, %v105_v2  ;;  %v263_v6 = vld [vmem:[#allocation8] sm:$0xff]  ;;  %v182_v8 = vld [vmem:[#allocation3] sm:$0xff]  ;;  %v376_v18 = vld [vmem:[#allocation11] ss:$0 sm:$0xff]  ;;  %s601_s5 = smov [#allocation14]   ;;  %vm354_vm3 = vcmask 261120  }
  0x70   :  { %424 = vset.pattern.permute.xlu0 %v600_v7  ;;  %v279_v11 = vld [vmem:[#allocation12] sm:$0xff]  ;;  %v280_v12 = vld [vmem:[#allocation12 + $0x8] sm:$0xff]  ;;  %s362_s1 = sshll.u32 %s601_s5, 4  ;;  %s363_s1 = int_to_ptr.vmem [resolvable:$true] %s362_s1 }
  0x71   :  { %407 = vmatpush3.bf16.msra.mxu0 %v406_v4  ;;  %267 = vperm.xlu0 %424, %v263_v6   ;;  %v409_v13 = vpack.c.bf16 %v280_v12, %v279_v11  ;;  %s557_s19 = scalar_lea.vmem %s363_s1, 128  ;;  %p562_p7 = scmp.lt.s32.totalorder %s363_s1, %s363_s1 }
  0x72   :  { %p558_p6 = scmp.ne.s32.totalorder %s363_s1, %s557_s19  ;;  %p563_p8 = scmp.lt.s32.totalorder %s557_s19, %s557_s19 }
  0x74   :  { %391 = vmatmul.mubr.msk.f32.vlgmr.msra.gmra.mrb[0].mxu0 %vm102_vm0, %v104_v5  ;;  %p564_p9 = por %p563_p8, %p562_p7 }
  0x75   :  { %v181_v14 = vld [vmem:[#allocation2] sm:$0xff] }
  0x76   :  { %p565_p10 = pnand %p564_p9, %p558_p6 }
  0xf0   :  { %v268_v19 = vpop.permute.xlu0 %267 }
  0xf1   :  { %v276_v20 = vmul.f32 %v376_v18, %v268_v19 }
 0x147   :  { %v177_v9 = vpop.f32.mrb[0].mxu0 }
 0x148   :  { %v392_v10 = vpop.f32.mrb[1].mxu0  ;;  %394 = vmatpush3.msra.mxu1 %v177_v9 }
 0x149   :  { %396 = vmatmul.mubr.msk.f32.vlgmr.msra.gmra.mrb[0].mxu1 %vm183_vm2, %v182_v8  ;;  %408 = vmatprep.subr.bf16.mxu1 %v597_v0 }
 0x14a   :  { %402 = vmatprep.mubr.msk.f32.mxu1 %vm598_vm1, %v599_v1  ;;  %410 = vmatpush3.bf16.msra.mxu1 %v409_v13 }
 0x21c   :  { %v253_v15 = vpop.f32.mrb[0].mxu1 }
 0x21d   :  { %v257_v16 = vadd.f32 %v253_v15, %v181_v14  ;;  %v397_v17 = vpop.f32.mrb[1].mxu1 }
 0x21f   :  { %258 = vst.msk [vmem:[#allocation2] sm:$0xff] %vm102_vm0, %v257_v16 }
 0x226   :  { %v262_v21 = vld [vmem:[#allocation2] sm:$0xff] }
 0x227   :  { %v277_v22 = vadd.f32 %v276_v20, %v262_v21 }
 0x229   :  { %v278_v23 = vmax.f32 %v277_v22, 0.0 }
 0x22b   :  { %403 = vmatmul.mubr.msk.f32.vlgmr.msra.gmra.mrb[2].mxu1 %vm102_vm0, %v278_v23 }
 0x2fe   :  { %v350_v24 = vpop.f32.mrb[2].mxu1 }
 0x2ff   :  { %v404_v25 = vpop.f32.mrb[3].mxu1  ;;  %355 = vst.msk [vmem:[#allocation14] sm:$0xff] %vm354_vm3, %v350_v24 }
 0x300   :  { %568 = shalt.err (!%p565_p10)
}
 0x301   :  { %s569_s21 = scalar_lea.hbm %s754_s6, 128 }
 0x302   :  { %p570_p11 = scmp.ne.s32.totalorder %s754_s6, %s569_s21  ;;  %p573_p12 = scmp.lt.u32.totalorder %s569_s21, %s754_s6 }
 0x304   :  { %p575_p13 = pnand %p573_p12, %p570_p11 }
 0x306   :  { %578 = shalt.err (!%p575_p13)
}
 0x307   :  { %365 = dma.vmem_to_hbm [thread:$0]  %s363_s1, 128, %s754_s6, [#allocation5]  }
 0x308   :  { %587 = dma.done.wait [#allocation5], 128  }
 0x309   :  { %588 = vsyncadd [#allocation5], 4294967168 }
 0x30a   :  { %369 = vsyncpa [#allocation4], 1 }
 0x30b   :  { %370 = vsyncpa [#allocation7], 1 }
 0x30c   :  { %371 = vsyncpa [#allocation10], 1 }
 0x30d   :  { %372 = vsyncpa [#allocation13], 1 }
 0x30e   :  { %373 = vsyncpa [#allocation5], 1 }

// kernel: edgenet_forward.5
= control target key start
LH: loop header
LB: loop body
LE: loop exit
PB: predicated region body
PF: predicated region fallthrough
CT: control target
= control target key end

     0   :  { %13 = vsyncpa [#allocation3], 0  ;;  %s943_s0 = inlined_call_operand.hbm [shape: s32[16,1], index: 0, kind: input, shape index: {}]   ;;  %s944_s1 = inlined_call_operand.hbm [shape: s32[16,1], index: 1, kind: input, shape index: {}]   ;;  %s945_s2 = inlined_call_operand.hbm [shape: f32[16,1], index: 2, kind: input, shape index: {}]   ;;  %s946_s3 = inlined_call_operand.hbm [shape: f32[8,32], index: 3, kind: input, shape index: {}]   ;;  %s947_s4 = inlined_call_operand.hbm [shape: f32[1,16], index: 4, kind: input, shape index: {}]   ;;  %s948_s5 = inlined_call_operand.hbm [shape: f32[1,16], index: 5, kind: input, shape index: {}]   ;;  %s949_s6 = inlined_call_operand.hbm [shape: f32[16,2], index: 6, kind: input, shape index: {}]   ;;  %s950_s7 = inlined_call_operand.hbm [shape: f32[1,2], index: 7, kind: input, shape index: {}]   ;;  %s951_s8 = inlined_call_operand.hbm [shape: f32[16,2], index: 8, kind: output, shape index: {}]  }
   0x1   :  { %14 = vsyncpa [#allocation6], 0 }
   0x2   :  { %15 = vsyncpa [#allocation9], 0 }
   0x3   :  { %16 = vsyncpa [#allocation12], 0 }
   0x4   :  { %17 = vsyncpa [#allocation15], 0 }
   0x5   :  { %18 = vsyncpa [#allocation4], 0  ;;  %s750_s27 = smov [#allocation5]   ;;  %s751_s29 = smov [#allocation8]  }
   0x6   :  { %s36_s28 = sshll.u32 %s750_s27, 4  ;;  %s61_s30 = sshll.u32 %s751_s29, 4  ;;  %s37_s28 = int_to_ptr.vmem [resolvable:$true] %s36_s28  ;;  %s62_s30 = int_to_ptr.vmem [resolvable:$true] %s61_s30 }
   0x7   :  { %s540_s11 = scalar_lea.hbm %s944_s1, 256 }
   0x8   :  { %p541_p0 = scmp.ne.s32.totalorder %s944_s1, %s540_s11  ;;  %p544_p1 = scmp.lt.u32.totalorder %s540_s11, %s944_s1 }
   0xa   :  { %p546_p2 = pnand %p544_p1, %p541_p0 }
   0xc   :  { %549 = shalt.err (!%p546_p2)
}
   0xd   :  { %s550_s16 = scalar_lea.vmem %s37_s28, 256  ;;  %p555_p4 = scmp.lt.s32.totalorder %s37_s28, %s37_s28 }
   0xe   :  { %p551_p3 = scmp.ne.s32.totalorder %s37_s28, %s550_s16  ;;  %p556_p5 = scmp.lt.s32.totalorder %s550_s16, %s550_s16 }
  0x10   :  { %p557_p6 = por %p556_p5, %p555_p4 }
  0x12   :  { %p558_p7 = pnand %p557_p6, %p551_p3 }
  0x14   :  { %561 = shalt.err (!%p558_p7)
}
  0x15   :  { %s752_s17 = smov 128   ;;  %s753_s18 = smov 8  }
  0x16   :  { %42 = dma.hbm_to_vmem [thread:$0]  %s944_s1, 256, %s37_s28, [#allocation6], %s752_s17, %s752_s17, %s753_s18  }
  0x17   :  { %s562_s23 = scalar_lea.hbm %s946_s3, 128 }
  0x18   :  { %p563_p8 = scmp.ne.s32.totalorder %s946_s3, %s562_s23  ;;  %p566_p9 = scmp.lt.u32.totalorder %s562_s23, %s946_s3 }
  0x1a   :  { %p568_p10 = pnand %p566_p9, %p563_p8 }
  0x1c   :  { %571 = shalt.err (!%p568_p10)
}
  0x1d   :  { %s572_s29 = scalar_lea.vmem %s62_s30, 128  ;;  %p577_p12 = scmp.lt.s32.totalorder %s62_s30, %s62_s30 }
  0x1e   :  { %p573_p11 = scmp.ne.s32.totalorder %s62_s30, %s572_s29  ;;  %p578_p13 = scmp.lt.s32.totalorder %s572_s29, %s572_s29 }
  0x20   :  { %p579_p0 = por %p578_p13, %p577_p12 }
  0x22   :  { %p580_p1 = pnand %p579_p0, %p573_p11 }
  0x24   :  { %583 = shalt.err (!%p580_p1)
}
  0x25   :  { %64 = dma.hbm_to_vmem [thread:$0]  %s946_s3, 128, %s62_s30, [#allocation9]  }
  0x26   :  { %s754_s9 = smov [#allocation11]   ;;  %s755_s11 = smov [#allocation2]  }
  0x27   :  { %s81_s10 = sshll.u32 %s754_s9, 4  ;;  %s24_s12 = sshll.u32 %s755_s11, 4  ;;  %s82_s10 = int_to_ptr.vmem [resolvable:$true] %s81_s10  ;;  %s836_s12 = int_to_ptr.vmem [resolvable:$true] %s24_s12 }
  0x28   :  { %s584_s15 = scalar_lea.hbm %s948_s5, 16 }
  0x29   :  { %p585_p2 = scmp.ne.s32.totalorder %s948_s5, %s584_s15  ;;  %p588_p3 = scmp.lt.u32.totalorder %s584_s15, %s948_s5 }
  0x2b   :  { %p590_p4 = pnand %p588_p3, %p585_p2 }
  0x2d   :  { %593 = shalt.err (!%p590_p4)
}
  0x2e   :  { %s594_s3 = scalar_lea.vmem %s82_s10, 16  ;;  %s598_s30 = scalar_lea.vmem %s82_s10, 32 }
  0x2f   :  { %p595_p5 = scmp.ne.s32.totalorder %s82_s10, %s594_s3  ;;  %p599_p6 = scmp.lt.s32.totalorder %s82_s10, %s82_s10 }
  0x30   :  { %p600_p7 = scmp.lt.s32.totalorder %s598_s30, %s594_s3 }
  0x32   :  { %p601_p8 = por %p600_p7, %p599_p6 }
  0x34   :  { %p602_p9 = pnand %p601_p8, %p595_p5 }
  0x36   :  { %605 = shalt.err (!%p602_p9)
}
  0x37   :  { %84 = dma.hbm_to_vmem [thread:$0]  %s948_s5, 16, %s82_s10, [#allocation12]  }
  0x38   :  { %s606_s26 = scalar_lea.hbm %s943_s0, 256 }
  0x39   :  { %p607_p10 = scmp.ne.s32.totalorder %s943_s0, %s606_s26  ;;  %p610_p11 = scmp.lt.u32.totalorder %s606_s26, %s943_s0 }
  0x3b   :  { %p612_p12 = pnand %p610_p11, %p607_p10 }
  0x3d   :  { %615 = shalt.err (!%p612_p12)
}
  0x3e   :  { %s616_s9 = scalar_lea.vmem %s836_s12, 256  ;;  %p621_p0 = scmp.lt.s32.totalorder %s836_s12, %s836_s12 }
  0x3f   :  { %p617_p13 = scmp.ne.s32.totalorder %s836_s12, %s616_s9  ;;  %p622_p1 = scmp.lt.s32.totalorder %s616_s9, %s616_s9 }
  0x41   :  { %p623_p2 = por %p622_p1, %p621_p0 }
  0x43   :  { %p624_p3 = pnand %p623_p2, %p617_p13 }
  0x45   :  { %627 = shalt.err (!%p624_p3)
}
  0x46   :  { %30 = dma.hbm_to_vmem [thread:$0]  %s943_s0, 256, %s836_s12, [#allocation3], %s752_s17, %s752_s17, %s753_s18  }
  0x47   :  { %s756_s11 = smov [#allocation7]   ;;  %s757_s14 = smov [#allocation10]  }
  0x48   :  { %s48_s13 = sshll.u32 %s756_s11, 4  ;;  %s71_s15 = sshll.u32 %s757_s14, 4  ;;  %s49_s13 = int_to_ptr.vmem [resolvable:$true] %s48_s13  ;;  %s72_s15 = int_to_ptr.vmem [resolvable:$true] %s71_s15 }
  0x49   :  { %s628_s20 = scalar_lea.hbm %s945_s2, 256 }
  0x4a   :  { %p629_p4 = scmp.ne.s32.totalorder %s945_s2, %s628_s20  ;;  %p632_p5 = scmp.lt.u32.totalorder %s628_s20, %s945_s2 }
  0x4c   :  { %p634_p6 = pnand %p632_p5, %p629_p4 }
  0x4e   :  { %637 = shalt.err (!%p634_p6)
}
  0x4f   :  { %s638_s0 = scalar_lea.vmem %s49_s13, 256  ;;  %p643_p8 = scmp.lt.s32.totalorder %s49_s13, %s49_s13 }
  0x50   :  { %p639_p7 = scmp.ne.s32.totalorder %s49_s13, %s638_s0  ;;  %p644_p9 = scmp.lt.s32.totalorder %s638_s0, %s638_s0 }
  0x52   :  { %p645_p10 = por %p644_p9, %p643_p8 }
  0x54   :  { %p646_p11 = pnand %p645_p10, %p639_p7 }
  0x56   :  { %649 = shalt.err (!%p646_p11)
}
  0x57   :  { %54 = dma.hbm_to_vmem [thread:$0]  %s945_s2, 256, %s49_s13, [#allocation6], %s752_s17, %s752_s17, %s753_s18  }
  0x58   :  { %s650_s26 = scalar_lea.hbm %s947_s4, 16 }
  0x59   :  { %p651_p12 = scmp.ne.s32.totalorder %s947_s4, %s650_s26  ;;  %p654_p13 = scmp.lt.u32.totalorder %s650_s26, %s947_s4 }
  0x5b   :  { %p656_p0 = pnand %p654_p13, %p651_p12 }
  0x5d   :  { %659 = shalt.err (!%p656_p0)
}
  0x5e   :  { %s660_s9 = scalar_lea.vmem %s72_s15, 16  ;;  %s664_s5 = scalar_lea.vmem %s72_s15, 32 }
  0x5f   :  { %p661_p1 = scmp.ne.s32.totalorder %s72_s15, %s660_s9  ;;  %p665_p2 = scmp.lt.s32.totalorder %s72_s15, %s72_s15 }
  0x60   :  { %p666_p3 = scmp.lt.s32.totalorder %s664_s5, %s660_s9 }
  0x62   :  { %p667_p4 = por %p666_p3, %p665_p2 }
  0x64   :  { %p668_p5 = pnand %p667_p4, %p661_p1 }
  0x66   :  { %671 = shalt.err (!%p668_p5)
}
  0x67   :  { %74 = dma.hbm_to_vmem [thread:$0]  %s947_s4, 16, %s72_s15, [#allocation9]  }
  0x68   :  { %s758_s11 = smov [#allocation13]   ;;  %s759_s14 = smov [#allocation14]  }
  0x69   :  { %s90_s13 = sshll.u32 %s758_s11, 4  ;;  %s103_s16 = sshll.u32 %s759_s14, 4  ;;  %s91_s13 = int_to_ptr.vmem [resolvable:$true] %s90_s13  ;;  %s104_s16 = int_to_ptr.vmem [resolvable:$true] %s103_s16 }
  0x6a   :  { %s672_s21 = scalar_lea.hbm %s949_s6, 256 }
  0x6b   :  { %p673_p6 = scmp.ne.s32.totalorder %s949_s6, %s672_s21  ;;  %p676_p7 = scmp.lt.u32.totalorder %s672_s21, %s949_s6 }
  0x6d   :  { %p678_p8 = pnand %p676_p7, %p673_p6 }
  0x6f   :  { %681 = shalt.err (!%p678_p8)
}
  0x70   :  { %s682_s4 = scalar_lea.vmem %s91_s13, 256  ;;  %p687_p10 = scmp.lt.s32.totalorder %s91_s13, %s91_s13 }
  0x71   :  { %p683_p9 = scmp.ne.s32.totalorder %s91_s13, %s682_s4  ;;  %p688_p11 = scmp.lt.s32.totalorder %s682_s4, %s682_s4 }
  0x73   :  { %p689_p12 = por %p688_p11, %p687_p10 }
  0x75   :  { %p690_p13 = pnand %p689_p12, %p683_p9 }
  0x77   :  { %693 = shalt.err (!%p690_p13)
}
  0x78   :  { %96 = dma.hbm_to_vmem [thread:$0]  %s949_s6, 256, %s91_s13, [#allocation12], %s752_s17, %s752_s17, %s753_s18  }
  0x79   :  { %s694_s25 = scalar_lea.hbm %s950_s7, 16 }
  0x7a   :  { %p695_p0 = scmp.ne.s32.totalorder %s950_s7, %s694_s25  ;;  %p698_p1 = scmp.lt.u32.totalorder %s694_s25, %s950_s7 }
  0x7c   :  { %p700_p2 = pnand %p698_p1, %p695_p0 }
  0x7e   :  { %703 = shalt.err (!%p700_p2)
}
  0x7f   :  { %s704_s28 = scalar_lea.vmem %s104_s16, 16  ;;  %s708_s9 = scalar_lea.vmem %s104_s16, 32 }
  0x80   :  { %p705_p3 = scmp.ne.s32.totalorder %s104_s16, %s704_s28  ;;  %p709_p4 = scmp.lt.s32.totalorder %s104_s16, %s104_s16 }
  0x81   :  { %p710_p5 = scmp.lt.s32.totalorder %s708_s9, %s704_s28 }
  0x83   :  { %p711_p6 = por %p710_p5, %p709_p4 }
  0x85   :  { %p712_p7 = pnand %p711_p6, %p705_p3 }
  0x87   :  { %715 = shalt.err (!%p712_p7)
}
  0x88   :  { %106 = dma.hbm_to_vmem [thread:$0]  %s950_s7, 16, %s104_s16, [#allocation15]  }
  0x89   :  { %738 = dma.done.wait [#allocation3], 256  }
  0x8a   :  { %739 = vsyncadd [#allocation3], 4294967040 }
  0x8b   :  { %740 = dma.done.wait [#allocation6], 512  }
  0x8c   :  { %741 = vsyncadd [#allocation6], 4294966784 }
  0x8d   :  { %742 = dma.done.wait [#allocation9], 144  }
  0x8e   :  { %743 = vsyncadd [#allocation9], 4294967152 }
  0x8f   :  { %744 = dma.done.wait [#allocation12], 272  }
  0x90   :  { %745 = vsyncadd [#allocation12], 4294967024 }
  0x91   :  { %746 = dma.done.wait [#allocation15], 16  }
  0x92   :  { %747 = vsyncadd [#allocation15], 4294967280  ;;  %v760_v0 = vmov 0   ;;  %v133_v1 = vld [vmem:[#allocation5] sm:$0xff]  ;;  %v131_v2 = vld [vmem:[#allocation2] sm:$0xff]  ;;  %s761_s7 = smov 112   ;;  %v135_v8 = vlaneseq }
  0x93   :  { %539 = vset.pattern.permute.xlu1 %v760_v0  ;;  %538 = vset.pattern.permute.xlu0 %v760_v0  ;;  %v134_v3 = vld [vmem:[#allocation5 + $0x8] sm:$0xff]  ;;  %v161_v4 = vld [vmem:[#allocation8] sm:$0xff]  ;;  %v132_v5 = vld [vmem:[#allocation2 + $0x8] sm:$0xff]  ;;  %vm166_vm0 = vcmask 64512   ;;  %v762_v12 = vmov 0.0   ;;  %vm372_vm5 = vcmask 130048  }
  0x94   :  { %150 = vperm.xlu0 %538, %v133_v1   ;;  %138 = vperm.xlu1 %539, %v131_v2   ;;  %v329_v6 = vld [vmem:[#allocation7] sm:$0xff]  ;;  %v330_v7 = vld [vmem:[#allocation7 + $0x8] sm:$0xff]  ;;  %v136_v9 = vand.u32 127, %v135_v8  ;;  %v486_v24 = vld [vmem:[#allocation10] ss:$0 sm:$0xff]  ;;  %s763_s2 = smov [#allocation16]  }
  0x95   :  { %v363_v20 = vld [vmem:[#allocation13] sm:$0xff]  ;;  %v364_v21 = vld [vmem:[#allocation13 + $0x8] sm:$0xff]  ;;  %v487_v29 = vld [vmem:[#allocation11] ss:$0 sm:$0xff]  ;;  %s462_s10 = sshll.u32 %s763_s2, 4  ;;  %vm454_vm6 = vcmask 15360   ;;  %s463_s10 = int_to_ptr.vmem [resolvable:$true] %s462_s10 }
  0x96   :  { %v518_v22 = vpack.c.bf16 %v364_v21, %v363_v20  ;;  %v488_v37 = vld [vmem:[#allocation14] ss:$0 sm:$0xff]  ;;  %s716_s11 = scalar_lea.vmem %s463_s10, 256  ;;  %p721_p9 = scmp.lt.s32.totalorder %s463_s10, %s463_s10 }
  0x97   :  { %p717_p8 = scmp.ne.s32.totalorder %s463_s10, %s716_s11  ;;  %p722_p10 = scmp.lt.s32.totalorder %s716_s11, %s716_s11 }
  0x98   :  { %153 = vperm.xlu0 %538, %v134_v3   ;;  %163 = vrot.lane.b32.xlu1 %v161_v4, %s761_s7 }
  0x99   :  { %519 = vmatprep.subr.bf16.mxu1 %v518_v22  ;;  %p723_p11 = por %p722_p10, %p721_p9 }
  0x9a   :  { %521 = vmatpush3.bf16.msra.mxu1 %v518_v22 }
  0x9b   :  { %p724_p12 = pnand %p723_p11, %p717_p8 }
  0x9c   :  { %141 = vperm.xlu0 %538, %v132_v5   ;;  %334 = vperm.xlu1 %539, %v329_v6  }
  0xa0   :  { %339 = vperm.xlu0 %538, %v330_v7  }
 0x113   :  { %v151_v10 = vpop.permute.xlu0 %150  ;;  %v139_v11 = vpop.permute.xlu1 %138 }
 0x114   :  { %vm155_vm1 = vcmp.eq.s32.totalorder %v136_v9, %v151_v10  ;;  %vm143_vm2 = vcmp.eq.s32.totalorder %v136_v9, %v139_v11 }
 0x115   :  { %v480_v13 = vsel %vm155_vm1, 1.0, %v762_v12  ;;  %v478_v17 = vsel %vm143_vm2, 1.0, %v762_v12 }
 0x116   :  { %503 = vmatprep.mubr.msk.f32.mxu0 %vm166_vm0, %v480_v13 }
 0x117   :  { %v154_v14 = vpop.permute.xlu0 %153  ;;  %v164_v15 = vpop.permute.xlu1 %163 }
 0x118   :  { %vm156_vm3 = vcmp.eq.s32.totalorder %v136_v9, %v154_v14  ;;  %501 = vmatprep.subr.mxu0 %v164_v15 }
 0x119   :  { %v481_v16 = vsel %vm156_vm3, 1.0, %v762_v12  ;;  %502 = vmatpush3.msra.mxu0 %v164_v15 }
 0x11a   :  { %504 = vmatmul.mubr.msk.f32.vlgmr.msra.gmra.mrb[0].mxu0 %vm166_vm0, %v481_v16  ;;  %506 = vmatprep.subr.mxu0 %v161_v4 }
 0x11b   :  { %v142_v18 = vpop.permute.xlu0 %141  ;;  %507 = vmatpush3.msra.mxu0 %v161_v4  ;;  %508 = vmatprep.mubr.msk.f32.mxu0 %vm166_vm0, %v478_v17  ;;  %v335_v25 = vpop.permute.xlu1 %334 }
 0x11c   :  { %vm144_vm4 = vcmp.eq.s32.totalorder %v136_v9, %v142_v18  ;;  %v348_v27 = vmul.f32 %v486_v24, %v335_v25 }
 0x11d   :  { %v479_v19 = vsel %vm144_vm4, 1.0, %v762_v12 }
 0x11f   :  { %v340_v23 = vpop.permute.xlu0 %339 }
 0x120   :  { %v349_v26 = vmul.f32 %v486_v24, %v340_v23 }
 0x122   :  { %509 = vmatmul.mubr.msk.f32.vlgmr.msra.gmra.mrb[0].mxu0 %vm166_vm0, %v479_v19 }
 0x1f5   :  { %v510_v28 = vpop.f32.mrb[0].mxu0 }
 0x1f6   :  { %v351_v30 = vadd.f32 %v510_v28, %v349_v26  ;;  %v320_v31 = vpop.f32.mrb[1].mxu0 }
 0x1f7   :  { %v350_v32 = vadd.f32 %v348_v27, %v320_v31 }
 0x1f8   :  { %v360_v33 = vadd.f32 %v487_v29, %v351_v30 }
 0x1f9   :  { %v359_v34 = vadd.f32 %v487_v29, %v350_v32 }
 0x1fa   :  { %v362_v36 = vmax.f32 %v360_v33, 0.0 }
 0x1fb   :  { %v361_v35 = vmax.f32 %v359_v34, 0.0 }
 0x1fd   :  { %515 = vmatprep.mubr.msk.f32.mxu1 %vm372_vm5, %v361_v35 }
 0x1fe   :  { %516 = vmatmul.mubr.msk.f32.vlgmr.msra.gmra.mrb[0].mxu1 %vm372_vm5, %v362_v36 }
 0x2d1   :  { %v517_v38 = vpop.f32.mrb[0].mxu1 }
 0x2d2   :  { %v451_v39 = vadd.f32 %v517_v38, %v488_v37  ;;  %v445_v40 = vpop.f32.mrb[1].mxu1 }
 0x2d3   :  { %v446_v41 = vadd.f32 %v488_v37, %v445_v40 }
 0x2d4   :  { %456 = vst.msk [vmem:[#allocation16 + $0x8] sm:$0xff] %vm454_vm6, %v451_v39 }
 0x2d5   :  { %455 = vst.msk [vmem:[#allocation16] sm:$0xff] %vm454_vm6, %v446_v41 }
 0x2d6   :  { %727 = shalt.err (!%p724_p12)
}
 0x2d7   :  { %s728_s16 = scalar_lea.hbm %s951_s8, 256 }
 0x2d8   :  { %p729_p13 = scmp.ne.s32.totalorder %s951_s8, %s728_s16  ;;  %p732_p0 = scmp.lt.u32.totalorder %s728_s16, %s951_s8 }
 0x2da   :  { %p734_p1 = pnand %p732_p0, %p729_p13 }
 0x2dc   :  { %737 = shalt.err (!%p734_p1)
}
 0x2dd   :  { %468 = dma.vmem_to_hbm [thread:$0]  %s463_s10, 256, %s951_s8, [#allocation4], %s752_s17, %s752_s17, %s753_s18  }
 0x2de   :  { %748 = dma.done.wait [#allocation4], 256  }
 0x2df   :  { %749 = vsyncadd [#allocation4], 4294967040 }
 0x2e0   :  { %472 = vsyncpa [#allocation3], 1 }
 0x2e1   :  { %473 = vsyncpa [#allocation6], 1 }
 0x2e2   :  { %474 = vsyncpa [#allocation9], 1 }
 0x2e3   :  { %475 = vsyncpa [#allocation12], 1 }
 0x2e4   :  { %476 = vsyncpa [#allocation15], 1 }
 0x2e5   :  { %477 = vsyncpa [#allocation4], 1 }

</bundles_post_ra>
